<compile_context>
chip_gen: v7x
topology: tpu7x:2x2x1
jax: 0.10.0
libtpu: 0.0.40
codegen_flags: <defaults>
</compile_context>

<pallas_src>
import math

import jax
import jax.numpy as jnp
from jax import lax
from jax.experimental import pallas as pl
from jax.experimental.pallas import tpu as pltpu


_ONE_BITS = 0x3F800000   # int32 bit pattern of float32 1.0 == max possible exp(attn - max)
_BISECT_ITERS = 30       # ceil(log2(0x3F800001)): pins the K-th largest key exactly


def _round_up(x, m):
    return (x + m - 1) // m * m


def hgnn_layer(image, text, k, params, *, mxu_dtype=jnp.bfloat16, max_txt_tile=1024):
    """Fused HGNN_layer forward.  image (B,N_img,in_ch), text (B,N_txt,E), k (B,)."""
    B, N_img, in_ch = image.shape
    _, N_txt, E = text.shape
    eps = 1e-5

    compute_dtype = jnp.dtype(mxu_dtype) if mxu_dtype is not None else image.dtype

    # K_neigs = round(N_img * k * alpha), alpha == 1.  Clamped to [0, N_img]
    # (torch.topk would raise for K > N_img; K == 0 selects nothing).
    k_neigs = jnp.clip(jnp.round(N_img * k), 0, N_img).astype(jnp.int32)

    # Eval-mode BatchNorm folded to per-channel scale/shift; 1/sqrt(in_ch) folded
    # into the BN1 constants.  BN1 constants are (in_ch, 1) because text_emb is
    # produced in (channel, text) layout; BN2 constants are (1, in_ch) for the
    # (N_img, in_ch) accumulator.
    # TODO(synk): BatchNorm training-mode batch statistics (cross-batch reduction)
    # are not implemented; eval-mode running stats are used instead.
    inv_sqrt = 1.0 / math.sqrt(in_ch)
    bn1_scale = params["bn1_gamma"] / jnp.sqrt(params["bn1_var"] + eps)
    bn1_shift = params["bn1_beta"] - params["bn1_mean"] * bn1_scale
    s1 = (bn1_scale * inv_sqrt).reshape(in_ch, 1).astype(jnp.float32)
    sh1 = (bn1_shift * inv_sqrt).reshape(in_ch, 1).astype(jnp.float32)
    bn2_scale = params["bn2_gamma"] / jnp.sqrt(params["bn2_var"] + eps)
    bn2_shift = params["bn2_beta"] - params["bn2_mean"] * bn2_scale
    s2 = bn2_scale.reshape(1, in_ch).astype(jnp.float32)
    sh2 = bn2_shift.reshape(1, in_ch).astype(jnp.float32)

    # Fused, channel-major weights: one (2C, E) x (tn, E)^T matmul per tile yields
    # [conv-branch ; linear-branch] already transposed to (channel, text).
    w_cat = jnp.concatenate([params["w1"], params["w_out"]], axis=0).astype(compute_dtype)
    b_cat = jnp.concatenate([params["b1"], params["b_out"]]).reshape(2 * in_ch, 1).astype(jnp.float32)

    # --- generation-aware VMEM budget and lane-dense text tile ------------------
    vmem_cap = 128 * 1024 * 1024
    try:
        vmem_cap = int(pltpu.get_tpu_info().vmem_capacity_bytes)
    except Exception:
        pass
    # ~64 MiB scoped on v5e/v6e (128 MiB physical), ~48 MiB on v7x (64 MiB physical).
    vmem_limit = int(min(64 * 1024 * 1024, (vmem_cap * 3) // 4))

    in_dsize = jnp.dtype(image.dtype).itemsize
    budget = int(vmem_limit * 0.6)                         # leave headroom for the compiler
    fixed = 4 * N_img * in_ch * in_dsize + 4 * N_img * in_ch          # image+out (2x buf) + acc
    per_tn = 2 * E * in_dsize + 10 * N_img + 16 * in_ch               # text 2x buf + ~2.5 (N_img,tn) f32 temps + cat temps
    cap = max(128, (int(max_txt_tile) // 128) * 128)
    tn = max(128, min(((max(budget - fixed, 0) // max(per_tn, 1)) // 128) * 128, cap))
    tn = min(tn, _round_up(N_txt, 128))                    # tn is always a multiple of 128

    N_txt_pad = _round_up(N_txt, tn)
    text_in = text if N_txt_pad == N_txt else jnp.pad(
        text, ((0, 0), (0, N_txt_pad - N_txt), (0, 0)))
    n_txt_tiles = N_txt_pad // tn

    # --- kernel ------------------------------------------------------------------
    def kernel(k_ref,                                   # scalar prefetch (SMEM): (B,) int32 K_neigs
               image_ref, text_ref,                     # (1, N_img, in_ch), (1, tn, E)
               wcat_ref, bcat_ref,                      # (2C, E), (2C, 1)
               s1_ref, sh1_ref, s2_ref, sh2_ref,        # BN constants
               out_ref,                                 # (1, N_img, in_ch)
               acc_ref):                                # VMEM (N_img, in_ch) f32 accumulator
        b = pl.program_id(0)
        j = pl.program_id(1)

        @pl.when(j == 0)
        def _init():
            acc_ref[...] = jnp.zeros_like(acc_ref)

        image_blk = image_ref[0]                                  # (N_img, in_ch), input dtype
        text_blk = text_ref[0].astype(compute_dtype)              # (tn, E)

        # Fused Conv1d(k=1) + Linear, produced in (channel, text) layout.
        cat = lax.dot_general(wcat_ref[...], text_blk, (((1,), (1,)), ((), ())),
                              preferred_element_type=jnp.float32) + bcat_ref[...]   # (2C, tn)
        t1 = cat[:in_ch, :]
        out_lin = cat[in_ch:, :]

        # BN1 (eval, folded) + ReLU; 1/sqrt(in_ch) already folded into s1/sh1.
        text_emb = jnp.maximum(t1 * s1_ref[...] + sh1_ref[...], 0.0)                # (C, tn) f32

        # attn[i, t] = <image[i], text_emb[:, t]>  (already scaled) -- plain A @ B.
        attn = jnp.dot(image_blk.astype(compute_dtype), text_emb.astype(compute_dtype),
                       preferred_element_type=jnp.float32)                          # (N_img, tn)

        # Numerically-stable softmax pieces over the image axis; attn dies after e.
        m = jnp.max(attn, axis=0, keepdims=True)
        e = jnp.exp(attn - m)                                                       # (N_img, tn), in [0, 1]
        denom = jnp.sum(e, axis=0, keepdims=True)
        recip = pl.reciprocal(denom, approx=True)                                   # (1, tn)

        if N_txt_pad != N_txt:
            # Kill padded text columns (their contribution flows only through recip).
            col = lax.broadcasted_iota(jnp.int32, (1, tn), 1) + j * tn
            recip = jnp.where(col < N_txt, recip, 0.0)

        # Per-column top-K threshold along the image axis: binary search on the
        # monotone int32 bit pattern of e (read-only, K-independent).
        kneigs = k_ref[b]
        key = pltpu.bitcast(e, jnp.int32)                                           # keys in [0, 0x3F800000]
        k_f = kneigs.astype(jnp.float32)

        def bisect(_, carry):
            lo, hi = carry
            mid = (lo + hi + 1) >> 1                     # keys are non-negative: no overflow
            cnt = jnp.sum(jnp.where(key >= mid, 1.0, 0.0), axis=0, keepdims=True)
            ge = cnt >= k_f
            return jnp.where(ge, mid, lo), jnp.where(ge, hi, mid - 1)

        lo0 = jnp.zeros((1, tn), jnp.int32)
        hi0 = jnp.full((1, tn), _ONE_BITS, jnp.int32)
        lo, _ = lax.fori_loop(0, _BISECT_ITERS, bisect, (lo0, hi0))

        # mask == "attn >= K-th largest per column"; ties may over-select (same as
        # before, a.s. exact for float inputs).  K == 0 selects nothing.
        p = jnp.where(jnp.logical_and(key >= lo, kneigs > 0), e, 0.0)               # un-normalized masked softmax

        # Fold the 1/denom normalization into out_lin's text columns
        # ((C, tn) multiply instead of (N_img, tn)).
        out_scaled = out_lin * recip                                                # (C, tn)

        # acc += p @ out_scaled^T  (contraction over this text tile)
        acc_ref[...] += lax.dot_general(p.astype(compute_dtype),
                                        out_scaled.astype(compute_dtype),
                                        (((1,), (1,)), ((), ())),
                                        preferred_element_type=jnp.float32)

        @pl.when(j == pl.num_programs(1) - 1)
        def _finalize():
            out = acc_ref[...] * s2_ref[...] + sh2_ref[...]                         # BN2 (eval, folded)
            out = jnp.maximum(out, 0.0) + image_blk.astype(jnp.float32)             # residual
            # Output layout (N_img, in_ch lanes) is fixed by the module interface.
            out_ref[...] = out[None].astype(out_ref.dtype)

    def rep(shape):
        return pl.BlockSpec(shape, lambda b, j, kref, _n=len(shape): (0,) * _n)

    grid_spec = pltpu.PrefetchScalarGridSpec(
        num_scalar_prefetch=1,
        grid=(B, n_txt_tiles),
        in_specs=[
            pl.BlockSpec((1, N_img, in_ch), lambda b, j, kref: (b, 0, 0)),   # image (resident over j)
            pl.BlockSpec((1, tn, E), lambda b, j, kref: (b, j, 0)),          # text tile
            rep((2 * in_ch, E)),                                             # fused weights (channel-major)
            rep((2 * in_ch, 1)),                                             # fused biases
            rep((in_ch, 1)), rep((in_ch, 1)),                                # BN1 scale/shift
            rep((1, in_ch)), rep((1, in_ch)),                                # BN2 scale/shift
        ],
        out_specs=pl.BlockSpec((1, N_img, in_ch), lambda b, j, kref: (b, 0, 0)),
        scratch_shapes=[pltpu.VMEM((N_img, in_ch), jnp.float32)],            # output accumulator
    )

    # TODO(synk): v7x megacore -- split the text-tile axis across the two TensorCores
    # (per-core partial accumulators + a small combine pass); batch is currently the
    # only "parallel" grid axis.
    return pl.pallas_call(
        kernel,
        out_shape=jax.ShapeDtypeStruct((B, N_img, in_ch), image.dtype),
        grid_spec=grid_spec,
        compiler_params=pltpu.CompilerParams(
            dimension_semantics=("parallel", "arbitrary"),
            vmem_limit_bytes=vmem_limit,
        ),
    )(k_neigs, image, text_in, w_cat, b_cat, s1, sh1, s2, sh2)


def hgnn_ref(image, text, k, params):
    """Pure-JAX reference mirroring the torch forward (eval-mode BN)."""
    B, N_img, in_ch = image.shape
    eps = 1e-5
    bn1_scale = params["bn1_gamma"] / jnp.sqrt(params["bn1_var"] + eps)
    bn1_shift = params["bn1_beta"] - params["bn1_mean"] * bn1_scale
    bn2_scale = params["bn2_gamma"] / jnp.sqrt(params["bn2_var"] + eps)
    bn2_shift = params["bn2_beta"] - params["bn2_mean"] * bn2_scale

    text_emb = jnp.einsum("bte,ce->btc", text, params["w1"]) + params["b1"]
    text_emb = jax.nn.relu(text_emb * bn1_scale + bn1_shift)
    attn = jnp.einsum("bnc,btc->bnt", image, text_emb) / math.sqrt(in_ch)

    K_neigs = jnp.round(N_img * k).astype(jnp.int32)
    order = jnp.argsort(-attn, axis=1)
    ranks = jnp.argsort(order, axis=1)                 # rank of each row within its column
    mask = ranks < K_neigs[:, None, None]

    sm = jax.nn.softmax(attn, axis=1)                  # softmax over image dim (dim=-2)
    attn_topk = jnp.where(mask, sm, 0.0)

    out_lin = jnp.einsum("bte,ce->btc", text, params["w_out"]) + params["b_out"]
    out = jnp.einsum("bnt,btc->bnc", attn_topk, out_lin)
    out = jax.nn.relu(out * bn2_scale + bn2_shift) + image
    return out


if __name__ == "__main__":
    B, N_img, N_txt = 2, 16, 8
    in_ch, embed_dim = 16, 32

    key = jax.random.PRNGKey(0)
    ks = jax.random.split(key, 6)

    params = {
        "w1": jax.random.normal(ks[0], (in_ch, embed_dim), jnp.float32) / math.sqrt(embed_dim),
        "b1": jax.random.normal(ks[1], (in_ch,), jnp.float32) * 0.01,
        "w_out": jax.random.normal(ks[2], (in_ch, embed_dim), jnp.float32) / math.sqrt(embed_dim),
        "b_out": jax.random.normal(ks[3], (in_ch,), jnp.float32) * 0.01,
        # BatchNorm params at PyTorch defaults (fresh module, eval mode)
        "bn1_gamma": jnp.ones((in_ch,), jnp.float32),
        "bn1_beta": jnp.zeros((in_ch,), jnp.float32),
        "bn1_mean": jnp.zeros((in_ch,), jnp.float32),
        "bn1_var": jnp.ones((in_ch,), jnp.float32),
        "bn2_gamma": jnp.ones((in_ch,), jnp.float32),
        "bn2_beta": jnp.zeros((in_ch,), jnp.float32),
        "bn2_mean": jnp.zeros((in_ch,), jnp.float32),
        "bn2_var": jnp.ones((in_ch,), jnp.float32),
    }

    image = jax.random.normal(ks[4], (B, N_img, in_ch), jnp.float32)
    text = jax.random.normal(ks[5], (B, N_txt, embed_dim), jnp.float32)
    k = jnp.array([0.25, 0.5], jnp.float32)   # -> K_neigs = [4, 8]

    ref = hgnn_ref(image, text, k, params)

    # Exact-precision path (f32 MXU operands): tight check against the pure-JAX
    # reference.  Tolerance covers the approximate (EUP) softmax reciprocal.
    out = hgnn_layer(image, text, k, params, mxu_dtype=jnp.float32)
    out = jax.block_until_ready(out)
    assert out.shape == (B, N_img, in_ch)
    assert jnp.allclose(out, ref, atol=2e-3, rtol=2e-3), (
        f"max abs err {jnp.max(jnp.abs(out - ref))}")

    # Default path (bf16 MXU operands, f32 accumulation): sanity only -- bf16
    # rounding can legally flip which element sits at the top-K boundary, so no
    # tight element-wise compare here.
    out_bf = jax.block_until_ready(hgnn_layer(image, text, k, params))
    assert out_bf.shape == (B, N_img, in_ch)
    assert bool(jnp.all(jnp.isfinite(out_bf)))

    print("KERNEL_OK")
</pallas_src>

<mosaic_0001>
module attributes {stable_mosaic.version = 11 : i64} {
  func.func @kernel(%arg0: i32, %arg1: i32, %arg2: memref<2xi32, #tpu.memory_space<smem>>, %arg3: memref<1x16x16xf32, #tpu.memory_space<vmem>>, %arg4: memref<1x128x32xf32, #tpu.memory_space<vmem>>, %arg5: memref<32x32xf32, #tpu.memory_space<vmem>>, %arg6: memref<32x1xf32, #tpu.memory_space<vmem>>, %arg7: memref<16x1xf32, #tpu.memory_space<vmem>>, %arg8: memref<16x1xf32, #tpu.memory_space<vmem>>, %arg9: memref<1x16xf32, #tpu.memory_space<vmem>>, %arg10: memref<1x16xf32, #tpu.memory_space<vmem>>, %arg11: memref<1x16x16xf32, #tpu.memory_space<vmem>>, %arg12: memref<16x16xf32, #tpu.memory_space<vmem>>) attributes {dimension_semantics = [#tpu.dimension_semantics<parallel>, #tpu.dimension_semantics<arbitrary>], iteration_bounds = array<i64: 2, 1>, scalar_prefetch = 1 : i64, scratch_operands = 1 : i64, tpu.core_type = #tpu.core_type<tc>, window_params = [{transform_indices = @transform_0, window_bounds = array<i64: 1, 16, 16>}, {transform_indices = @transform_1, window_bounds = array<i64: 1, 128, 32>}, {pipeline_mode = #tpu.pipeline_mode<synchronous>, transform_indices = @transform_2, window_bounds = array<i64: 32, 32>}, {pipeline_mode = #tpu.pipeline_mode<synchronous>, transform_indices = @transform_3, window_bounds = array<i64: 32, 1>}, {pipeline_mode = #tpu.pipeline_mode<synchronous>, transform_indices = @transform_4, window_bounds = array<i64: 16, 1>}, {pipeline_mode = #tpu.pipeline_mode<synchronous>, transform_indices = @transform_5, window_bounds = array<i64: 16, 1>}, {pipeline_mode = #tpu.pipeline_mode<synchronous>, transform_indices = @transform_6, window_bounds = array<i64: 1, 16>}, {pipeline_mode = #tpu.pipeline_mode<synchronous>, transform_indices = @transform_7, window_bounds = array<i64: 1, 16>}, {transform_indices = @transform_8, window_bounds = array<i64: 1, 16, 16>}]} {
    %c0_i32 = arith.constant 0 : i32
    %0 = arith.cmpi eq, %arg1, %c0_i32 : i32
    %1 = arith.extui %0 : i1 to i32
    %c0_i32_0 = arith.constant 0 : i32
    %2 = arith.cmpi ne, %1, %c0_i32_0 : i32
    scf.if %2 {
      %cst_30 = arith.constant 0.000000e+00 : f32
      %63 = vector.broadcast %cst_30 : f32 to vector<16x16xf32>
      %c0_31 = arith.constant 0 : index
      %c0_32 = arith.constant 0 : index
      %64 = vector.load %arg12[%c0_31, %c0_32] : memref<16x16xf32, #tpu.memory_space<vmem>>, vector<16x16xf32>
      tpu.vector_store %arg12[%c0_31, %c0_32], %63 {strides = array<i32>} : memref<16x16xf32, #tpu.memory_space<vmem>>, vector<16x16xf32>,
    } else {
    }
    %c0 = arith.constant 0 : index
    %c0_1 = arith.constant 0 : index
    %c0_2 = arith.constant 0 : index
    %3 = vector.load %arg3[%c0, %c0_1, %c0_2] : memref<1x16x16xf32, #tpu.memory_space<vmem>>, vector<1x16x16xf32>
    %4 = vector.shape_cast %3 : vector<1x16x16xf32> to vector<16x16xf32>
    %c0_3 = arith.constant 0 : index
    %c0_4 = arith.constant 0 : index
    %c0_5 = arith.constant 0 : index
    %5 = vector.load %arg4[%c0_3, %c0_4, %c0_5] : memref<1x128x32xf32, #tpu.memory_space<vmem>>, vector<1x128x32xf32>
    %6 = vector.shape_cast %5 : vector<1x128x32xf32> to vector<128x32xf32>
    %c0_6 = arith.constant 0 : index
    %c0_7 = arith.constant 0 : index
    %7 = vector.load %arg5[%c0_6, %c0_7] : memref<32x32xf32, #tpu.memory_space<vmem>>, vector<32x32xf32>
    %cst = arith.constant dense<0.000000e+00> : vector<32x128xf32>
    %8 = tpu.matmul %7, %6, %cst {dimension_numbers = #tpu.dot_dimension_numbers<[1], [1], [0], [0], [0, 0, 1, 0], [], []>} : vector<32x32xf32>, vector<128x32xf32>, vector<32x128xf32> -> vector<32x128xf32>
    %c0_8 = arith.constant 0 : index
    %c0_9 = arith.constant 0 : index
    %9 = vector.load %arg6[%c0_8, %c0_9] : memref<32x1xf32, #tpu.memory_space<vmem>>, vector<32x1xf32>
    %10 = vector.broadcast %9 : vector<32x1xf32> to vector<32x128xf32>
    %11 = arith.addf %8, %10 : vector<32x128xf32>
    %12 = vector.extract_strided_slice %11 {offsets = [0, 0], sizes = [16, 128], strides = [1, 1]} : vector<32x128xf32> to vector<16x128xf32>
    %13 = vector.extract_strided_slice %11 {offsets = [16, 0], sizes = [16, 128], strides = [1, 1]} : vector<32x128xf32> to vector<16x128xf32>
    %c0_10 = arith.constant 0 : index
    %c0_11 = arith.constant 0 : index
    %14 = vector.load %arg7[%c0_10, %c0_11] : memref<16x1xf32, #tpu.memory_space<vmem>>, vector<16x1xf32>
    %15 = vector.broadcast %14 : vector<16x1xf32> to vector<16x128xf32>
    %16 = arith.mulf %12, %15 : vector<16x128xf32>
    %c0_12 = arith.constant 0 : index
    %c0_13 = arith.constant 0 : index
    %17 = vector.load %arg8[%c0_12, %c0_13] : memref<16x1xf32, #tpu.memory_space<vmem>>, vector<16x1xf32>
    %18 = vector.broadcast %17 : vector<16x1xf32> to vector<16x128xf32>
    %19 = arith.addf %16, %18 : vector<16x128xf32>
    %cst_14 = arith.constant 0.000000e+00 : f32
    %20 = vector.broadcast %cst_14 : f32 to vector<16x128xf32>
    %21 = arith.maximumf %19, %20 : vector<16x128xf32>
    %cst_15 = arith.constant dense<0.000000e+00> : vector<16x128xf32>
    %22 = tpu.matmul %4, %21, %cst_15 {dimension_numbers = #tpu.dot_dimension_numbers<[1], [0], [0], [1], [0, 0, 1, 1], [], []>} : vector<16x16xf32>, vector<16x128xf32>, vector<16x128xf32> -> vector<16x128xf32>
    %cst_16 = arith.constant dense<0xFF800000> : vector<128xf32>
    %23 = vector.multi_reduction <maximumf>, %22, %cst_16 [0] : vector<16x128xf32> to vector<128xf32>
    %24 = vector.shape_cast %23 : vector<128xf32> to vector<1x128xf32>
    %25 = vector.broadcast %24 : vector<1x128xf32> to vector<16x128xf32>
    %26 = arith.subf %22, %25 : vector<16x128xf32>
    %27 = math.exp %26 : vector<16x128xf32>
    %cst_17 = arith.constant dense<0.000000e+00> : vector<128xf32>
    %28 = vector.multi_reduction <add>, %27, %cst_17 [0] : vector<16x128xf32> to vector<128xf32>
    %29 = vector.shape_cast %28 : vector<128xf32> to vector<1x128xf32>
    %30 = tpu.reciprocal %29 {approx = true} : vector<1x128xf32> -> vector<1x128xf32>
    %31 = tpu.iota {dimensions = array<i32: 1>} : vector<1x128xi32>
    %c128_i32 = arith.constant 128 : i32
    %32 = arith.muli %arg1, %c128_i32 : i32
    %33 = vector.broadcast %32 : i32 to vector<1x128xi32>
    %34 = arith.addi %31, %33 : vector<1x128xi32>
    %c8_i32 = arith.constant 8 : i32
    %35 = vector.broadcast %c8_i32 : i32 to vector<1x128xi32>
    %36 = arith.cmpi slt, %34, %35 : vector<1x128xi32>
    %cst_18 = arith.constant 0.000000e+00 : f32
    %37 = vector.broadcast %cst_18 : f32 to vector<1x128xf32>
    %38 = arith.select %36, %30, %37 : vector<1x128xi1>, vector<1x128xf32>
    %39 = arith.index_cast %arg0 : i32 to index
    %40 = memref.load %arg2[%39] : memref<2xi32, #tpu.memory_space<smem>>
    %41 = tpu.bitcast %27 : vector<16x128xf32> -> vector<16x128xi32>
    %42 = arith.sitofp %40 : i32 to f32
    %c0_i32_19 = arith.constant 0 : i32
    %43 = vector.broadcast %c0_i32_19 : i32 to vector<1x128xi32>
    %c1065353216_i32 = arith.constant 1065353216 : i32
    %44 = vector.broadcast %c1065353216_i32 : i32 to vector<1x128xi32>
    %c0_i32_20 = arith.constant 0 : i32
    %c30_i32 = arith.constant 30 : i32
    %45 = arith.addi %c0_i32_20, %c30_i32 : i32
    %c1_i32 = arith.constant 1 : i32
    %46:2 = scf.for %arg13 = %c0_i32_20 to %45 step %c1_i32 iter_args(%arg14 = %43, %arg15 = %44) -> (vector<1x128xi32>, vector<1x128xi32>)  : i32 {
      %63 = arith.addi %arg14, %arg15 : vector<1x128xi32>
      %c1_i32_30 = arith.constant 1 : i32
      %64 = vector.broadcast %c1_i32_30 : i32 to vector<1x128xi32>
      %65 = arith.addi %63, %64 : vector<1x128xi32>
      %c1_i32_31 = arith.constant 1 : i32
      %66 = vector.broadcast %c1_i32_31 : i32 to vector<1x128xi32>
      %67 = arith.shrsi %65, %66 : vector<1x128xi32>
      %68 = vector.broadcast %67 : vector<1x128xi32> to vector<16x128xi32>
      %69 = arith.cmpi sge, %41, %68 : vector<16x128xi32>
      %cst_32 = arith.constant 1.000000e+00 : f32
      %cst_33 = arith.constant 0.000000e+00 : f32
      %70 = vector.broadcast %cst_32 : f32 to vector<16x128xf32>
      %71 = vector.broadcast %cst_33 : f32 to vector<16x128xf32>
      %72 = arith.select %69, %70, %71 : vector<16x128xi1>, vector<16x128xf32>
      %cst_34 = arith.constant dense<0.000000e+00> : vector<128xf32>
      %73 = vector.multi_reduction <add>, %72, %cst_34 [0] : vector<16x128xf32> to vector<128xf32>
      %74 = vector.shape_cast %73 : vector<128xf32> to vector<1x128xf32>
      %75 = vector.broadcast %42 : f32 to vector<1x128xf32>
      %76 = arith.cmpf oge, %74, %75 : vector<1x128xf32>
      %77 = arith.select %76, %67, %arg14 : vector<1x128xi1>, vector<1x128xi32>
      %c1_i32_35 = arith.constant 1 : i32
      %78 = vector.broadcast %c1_i32_35 : i32 to vector<1x128xi32>
      %79 = arith.subi %67, %78 : vector<1x128xi32>
      %80 = arith.select %76, %arg15, %79 : vector<1x128xi1>, vector<1x128xi32>
      scf.yield %77, %80 : vector<1x128xi32>, vector<1x128xi32>
    }
    %47 = vector.broadcast %46#0 : vector<1x128xi32> to vector<16x128xi32>
    %48 = arith.cmpi sge, %41, %47 : vector<16x128xi32>
    %c0_i32_21 = arith.constant 0 : i32
    %49 = arith.cmpi sgt, %40, %c0_i32_21 : i32
    %50 = vector.broadcast %49 : i1 to vector<16x128xi1>
    %51 = arith.andi %48, %50 : vector<16x128xi1>
    %cst_22 = arith.constant 0.000000e+00 : f32
    %52 = vector.broadcast %cst_22 : f32 to vector<16x128xf32>
    %53 = arith.select %51, %27, %52 : vector<16x128xi1>, vector<16x128xf32>
    %54 = vector.broadcast %38 : vector<1x128xf32> to vector<16x128xf32>
    %55 = arith.mulf %13, %54 : vector<16x128xf32>
    %c0_23 = arith.constant 0 : index
    %c0_24 = arith.constant 0 : index
    %56 = vector.load %arg12[%c0_23, %c0_24] : memref<16x16xf32, #tpu.memory_space<vmem>>, vector<16x16xf32>
    %cst_25 = arith.constant dense<0.000000e+00> : vector<16x16xf32>
    %57 = tpu.matmul %53, %55, %cst_25 {dimension_numbers = #tpu.dot_dimension_numbers<[1], [1], [0], [0], [0, 0, 1, 0], [], []>} : vector<16x128xf32>, vector<16x128xf32>, vector<16x16xf32> -> vector<16x16xf32>
    %58 = arith.addf %56, %57 : vector<16x16xf32>
    %c0_26 = arith.constant 0 : index
    %c0_27 = arith.constant 0 : index
    %59 = vector.load %arg12[%c0_26, %c0_27] : memref<16x16xf32, #tpu.memory_space<vmem>>, vector<16x16xf32>
    tpu.vector_store %arg12[%c0_26, %c0_27], %58 {strides = array<i32>} : memref<16x16xf32, #tpu.memory_space<vmem>>, vector<16x16xf32>,
    %c0_i32_28 = arith.constant 0 : i32
    %60 = arith.cmpi eq, %arg1, %c0_i32_28 : i32
    %61 = arith.extui %60 : i1 to i32
    %c0_i32_29 = arith.constant 0 : i32
    %62 = arith.cmpi ne, %61, %c0_i32_29 : i32
    scf.if %62 {
      %c0_30 = arith.constant 0 : index
      %c0_31 = arith.constant 0 : index
      %63 = vector.load %arg12[%c0_30, %c0_31] : memref<16x16xf32, #tpu.memory_space<vmem>>, vector<16x16xf32>
      %c0_32 = arith.constant 0 : index
      %c0_33 = arith.constant 0 : index
      %64 = vector.load %arg9[%c0_32, %c0_33] : memref<1x16xf32, #tpu.memory_space<vmem>>, vector<1x16xf32>
      %65 = vector.broadcast %64 : vector<1x16xf32> to vector<16x16xf32>
      %66 = arith.mulf %63, %65 : vector<16x16xf32>
      %c0_34 = arith.constant 0 : index
      %c0_35 = arith.constant 0 : index
      %67 = vector.load %arg10[%c0_34, %c0_35] : memref<1x16xf32, #tpu.memory_space<vmem>>, vector<1x16xf32>
      %68 = vector.broadcast %67 : vector<1x16xf32> to vector<16x16xf32>
      %69 = arith.addf %66, %68 : vector<16x16xf32>
      %cst_36 = arith.constant 0.000000e+00 : f32
      %70 = vector.broadcast %cst_36 : f32 to vector<16x16xf32>
      %71 = arith.maximumf %69, %70 : vector<16x16xf32>
      %72 = arith.addf %71, %4 : vector<16x16xf32>
      %73 = vector.shape_cast %72 : vector<16x16xf32> to vector<1x16x16xf32>
      %c0_37 = arith.constant 0 : index
      %c0_38 = arith.constant 0 : index
      %c0_39 = arith.constant 0 : index
      %74 = vector.load %arg11[%c0_37, %c0_38, %c0_39] : memref<1x16x16xf32, #tpu.memory_space<vmem>>, vector<1x16x16xf32>
      tpu.vector_store %arg11[%c0_37, %c0_38, %c0_39], %73 {strides = array<i32>} : memref<1x16x16xf32, #tpu.memory_space<vmem>>, vector<1x16x16xf32>,
    } else {
    }
    return
  }
  func.func @transform_0(%arg0: i32, %arg1: i32, %arg2: memref<2xi32, #tpu.memory_space<smem>>) -> (i32, i32, i32) {
    %c0_i32 = arith.constant 0 : i32
    %c0_i32_0 = arith.constant 0 : i32
    %c0_i32_1 = arith.constant 0 : i32
    return %arg0, %c0_i32, %c0_i32_0 : i32, i32, i32
  }
  func.func @transform_1(%arg0: i32, %arg1: i32, %arg2: memref<2xi32, #tpu.memory_space<smem>>) -> (i32, i32, i32) {
    %c0_i32 = arith.constant 0 : i32
    %c0_i32_0 = arith.constant 0 : i32
    return %arg0, %arg1, %c0_i32 : i32, i32, i32
  }
  func.func @transform_2(%arg0: i32, %arg1: i32, %arg2: memref<2xi32, #tpu.memory_space<smem>>) -> (i32, i32) {
    %c0_i32 = arith.constant 0 : i32
    %c0_i32_0 = arith.constant 0 : i32
    %c0_i32_1 = arith.constant 0 : i32
    return %c0_i32, %c0_i32_0 : i32, i32
  }
  func.func @transform_3(%arg0: i32, %arg1: i32, %arg2: memref<2xi32, #tpu.memory_space<smem>>) -> (i32, i32) {
    %c0_i32 = arith.constant 0 : i32
    %c0_i32_0 = arith.constant 0 : i32
    %c0_i32_1 = arith.constant 0 : i32
    return %c0_i32, %c0_i32_0 : i32, i32
  }
  func.func @transform_4(%arg0: i32, %arg1: i32, %arg2: memref<2xi32, #tpu.memory_space<smem>>) -> (i32, i32) {
    %c0_i32 = arith.constant 0 : i32
    %c0_i32_0 = arith.constant 0 : i32
    %c0_i32_1 = arith.constant 0 : i32
    return %c0_i32, %c0_i32_0 : i32, i32
  }
  func.func @transform_5(%arg0: i32, %arg1: i32, %arg2: memref<2xi32, #tpu.memory_space<smem>>) -> (i32, i32) {
    %c0_i32 = arith.constant 0 : i32
    %c0_i32_0 = arith.constant 0 : i32
    %c0_i32_1 = arith.constant 0 : i32
    return %c0_i32, %c0_i32_0 : i32, i32
  }
  func.func @transform_6(%arg0: i32, %arg1: i32, %arg2: memref<2xi32, #tpu.memory_space<smem>>) -> (i32, i32) {
    %c0_i32 = arith.constant 0 : i32
    %c0_i32_0 = arith.constant 0 : i32
    %c0_i32_1 = arith.constant 0 : i32
    return %c0_i32, %c0_i32_0 : i32, i32
  }
  func.func @transform_7(%arg0: i32, %arg1: i32, %arg2: memref<2xi32, #tpu.memory_space<smem>>) -> (i32, i32) {
    %c0_i32 = arith.constant 0 : i32
    %c0_i32_0 = arith.constant 0 : i32
    %c0_i32_1 = arith.constant 0 : i32
    return %c0_i32, %c0_i32_0 : i32, i32
  }
  func.func @transform_8(%arg0: i32, %arg1: i32, %arg2: memref<2xi32, #tpu.memory_space<smem>>) -> (i32, i32, i32) {
    %c0_i32 = arith.constant 0 : i32
    %c0_i32_0 = arith.constant 0 : i32
    %c0_i32_1 = arith.constant 0 : i32
    return %arg0, %c0_i32, %c0_i32_0 : i32, i32, i32
  }
}

</mosaic_0001>

<bundles_post_ra>
// kernel: tpu_custom_call.1
= control target key start
LH: loop header
LB: loop body
LE: loop exit
PB: predicated region body
PF: predicated region fallthrough
CT: control target
= control target key end

     0   :  { %s2480_s0 = inlined_call_operand.hbm [shape: s32[2], index: 0, kind: input, shape index: {}]   ;;  %s2481_s1 = inlined_call_operand.hbm [shape: f32[2,16,16], index: 1, kind: input, shape index: {}]   ;;  %s2482_s2 = inlined_call_operand.hbm [shape: f32[2,128,32], index: 2, kind: input, shape index: {}]   ;;  %s2483_s3 = inlined_call_operand.hbm [shape: f32[32,32], index: 3, kind: input, shape index: {}]   ;;  %s2484_s4 = inlined_call_operand.hbm [shape: f32[32,1], index: 4, kind: input, shape index: {}]   ;;  %s2485_s5 = inlined_call_operand.hbm [shape: f32[16,1], index: 5, kind: input, shape index: {}]   ;;  %s2486_s6 = inlined_call_operand.hbm [shape: f32[16,1], index: 6, kind: input, shape index: {}]   ;;  %s2487_s7 = inlined_call_operand.hbm [shape: f32[1,16], index: 7, kind: input, shape index: {}]   ;;  %s2488_s8 = inlined_call_operand.hbm [shape: f32[1,16], index: 8, kind: input, shape index: {}]   ;;  %s2489_s9 = inlined_call_operand.hbm [shape: f32[2,16,16], index: 9, kind: output, shape index: {}]  }
   0x1   :  { %2498 = sst [smem:[#allocation29_spill]] %s2481_s1  ;;  %s1515_s11 = scalar_lea.hbm %s2480_s0, 16 }
   0x2   :  { %2499 = sst [smem:[#allocation30_spill]] %s2483_s3  ;;  %p1516_p0 = scmp.ne.s32.totalorder %s2480_s0, %s1515_s11 }
   0x3   :  { %2500 = sst [smem:[#allocation31_spill]] %s2484_s4  ;;  %p1519_p1 = scmp.lt.u32.totalorder %s1515_s11, %s2480_s0 }
   0x4   :  { %2501 = sst [smem:[#allocation32_spill]] %s2485_s5 }
   0x5   :  { %2502 = sst [smem:[#allocation33_spill]] %s2486_s6  ;;  %p1521_p2 = pnand %p1519_p1, %p1516_p0 }
   0x6   :  { %2503 = sst [smem:[#allocation34_spill]] %s2487_s7 }
   0x7   :  { %2504 = sst [smem:[#allocation35_spill]] %s2489_s9 }
   0x8   :  { %1524 = shalt.err (!%p1521_p2)  }
   0x9   :  { %s1883_s16 = smov [#allocation4]  }
   0xa   :  { %15 = dma.hbm_to_smem %s2480_s0, 16, %s1883_s16, [#allocation3] }
   0xb   :  { %1817 = dma.done.wait [#allocation3], 16 }
   0xc   :  { %1818 = vsyncadd [#allocation3], 4294967280 }
   0xd   :  { %17 = sfence }
   0xe   :  { %18 = vsyncpa [#allocation6], 0 }
   0xf   :  { %20 = vsyncpa [#allocation6 + $0x1], 0 }
  0x10   :  { %21 = vsyncpa [#allocation9], 0 }
  0x11   :  { %23 = vsyncpa [#allocation9 + $0x1], 0 }
  0x12   :  { %24 = vsyncpa [#allocation12], 0 }
  0x13   :  { %25 = vsyncpa [#allocation15], 0 }
  0x14   :  { %26 = vsyncpa [#allocation18], 0 }
  0x15   :  { %27 = vsyncpa [#allocation7], 0 }
  0x16   :  { %29 = vsyncpa [#allocation7 + $0x1], 0  ;;  %s1962_s19 = smov 0   ;;  %s1964_s20 = smov 0  }
  0x17   :  { %s1966_s21 = smov 0   ;;  %s1968_s22 = smov 0  }
  0x18   :  { %s1970_s0 = smov 0   ;;  %s1972_s23 = smov 0  }
  0x19 LB: > { %2505 = sst [smem:[#allocation28_spill]] %s1861_s22  ;;  %s1993_s24 = sadd.s32 4294967295, %s1869_s23   ;;  %s1869_s23 = sphi %s1972_s23, %s35_s23   ;;  %s1865_s0 = sphi %s1970_s0, %s2545_s0   ;;  %s1861_s22 = sphi %s1968_s22, %s2544_s22   ;;  %s1857_s21 = sphi %s1966_s21, %s2543_s21   ;;  %s1853_s20 = sphi %s1964_s20, %s2542_s20   ;;  %s1849_s19 = sphi %s1962_s19, %s2541_s19  }
  0x1a   : > { %p1152_p3 = scmp.ge.s32.totalorder %s1869_s23, 1  ;;  %p2491_p4 = scmp.eq.s32.totalorder %s1993_s24, 0 }
  0x1b   : > { %p258_p5 = scmp.lt.s32.totalorder %s1869_s23, 3  ;;  %s1884_s26 = smov [#allocation10]  }
  0x1c   : > { %s270_s27 = sshll.u32 %s1884_s26, 4  ;;  %s1885_s29 = smov [#allocation11]   ;;  %s2002_s27 = int_to_ptr.vmem [resolvable:$true] %s270_s27 }
  0x1d   : > { %p1998_p6 = pnand %p1152_p3, %p258_p5  ;;  %s283_s30 = sshll.u32 %s1885_s29, 4  ;;  %s2013_s30 = int_to_ptr.vmem [resolvable:$true] %s283_s30 }
  0x1e   : > { %s1886_s10 = smov [#allocation14]   ;;  %s2508_s3 = sld [smem:[#allocation30_spill]] }
  0x1f   : > { %s2506_s25 = scalar_select %p1998_p6, 1, 0 }
  0x20   : > { %p1377_p7 = pneg %p1998_p6  ;;  %s2015_s11 = sshll.u32 %s1886_s10, 4  ;;  %s310_s11 = int_to_ptr.vmem [resolvable:$true] %s2015_s11 }
  0x22   : > { %p2009_p9 = pnand %p1377_p7, %p2491_p4 }
  0x24   : > { %s1525_s14 = scalar_lea.hbm %s2508_s3, 512  ;;  %p2025_p11 = pneg %p2009_p9 }
  0x25   : > { %p1526_p10 = scmp.ne.s32.totalorder %s2508_s3, %s1525_s14  ;;  %p1532_p0 = scmp.lt.u32.totalorder %s1525_s14, %s2508_s3 }
  0x27   : > { %p1528_p12 = pnand %p2025_p11, %p1526_p10 }
  0x29   : > { %p1529_p13 = pneg %p1528_p12 }
  0x2b   : > { %p1534_p1 = pnand %p1532_p0, %p1529_p13 }
  0x2d   : > { %1537 = shalt.err (!%p1534_p1)
}
  0x2e   : > { %s1538_s29 = scalar_lea.vmem %s2002_s27, 512  ;;  %p1546_p7 = scmp.lt.s32.totalorder %s2002_s27, %s2002_s27 }
  0x2f   : > { %p1539_p2 = scmp.ne.s32.totalorder %s2002_s27, %s1538_s29  ;;  %p1547_p8 = scmp.lt.s32.totalorder %s1538_s29, %s1538_s29 }
  0x31   : > { %p1541_p3 = pnand %p1539_p2, %p2025_p11  ;;  %p1548_p10 = por %p1547_p8, %p1546_p7 }
  0x33   : > { %p1542_p5 = pneg %p1541_p3 }
  0x35   : > { %p1549_p12 = pnand %p1548_p10, %p1542_p5 }
  0x37   : > { %1552 = shalt.err (!%p1549_p12)
}
  0x38   : > { %s2493_s10 = smov 128   ;;  %s2495_s12 = smov 8  }
  0x39   : > { %1380 = dma.hbm_to_vmem [thread:$0]  (!%p2009_p9), %s2508_s3, 512, %s2002_s27, [#allocation9], %s2493_s10, %s2493_s10, %s2495_s12  }
  0x3a   : > { %s2510_s4 = sld [smem:[#allocation31_spill]] }
  0x40   : > { %s1553_s18 = scalar_lea.hbm %s2510_s4, 512 }
  0x41   : > { %p1554_p8 = scmp.ne.s32.totalorder %s2510_s4, %s1553_s18  ;;  %p1560_p1 = scmp.lt.u32.totalorder %s1553_s18, %s2510_s4 }
  0x43   : > { %p1556_p13 = pnand %p1554_p8, %p2025_p11 }
  0x45   : > { %p1557_p0 = pneg %p1556_p13 }
  0x47   : > { %p1562_p2 = pnand %p1560_p1, %p1557_p0 }
  0x49   : > { %1565 = shalt.err (!%p1562_p2)
}
  0x4a   : > { %s1566_s27 = scalar_lea.vmem %s2013_s30, 512  ;;  %p1574_p10 = scmp.lt.s32.totalorder %s2013_s30, %s2013_s30 }
  0x4b   : > { %p1567_p3 = scmp.ne.s32.totalorder %s2013_s30, %s1566_s27  ;;  %p1575_p12 = scmp.lt.s32.totalorder %s1566_s27, %s1566_s27 }
  0x4d   : > { %p1569_p5 = pnand %p1567_p3, %p2025_p11  ;;  %p1576_p8 = por %p1575_p12, %p1574_p10 }
  0x4f   : > { %p1570_p7 = pneg %p1569_p5 }
  0x51   : > { %p1577_p13 = pnand %p1576_p8, %p1570_p7 }
  0x53   : > { %1580 = shalt.err (!%p1577_p13)
}
  0x54   : > { %1383 = dma.hbm_to_vmem [thread:$0]  (!%p2009_p9), %s2510_s4, 512, %s2013_s30, [#allocation12], %s2493_s10, %s2493_s10, %s2495_s12  }
  0x55   : > { %s2511_s6 = sld [smem:[#allocation33_spill]] }
  0x5b   : > { %s1581_s15 = scalar_lea.hbm %s2511_s6, 256 }
  0x5c   : > { %p1582_p0 = scmp.ne.s32.totalorder %s2511_s6, %s1581_s15  ;;  %p1588_p3 = scmp.lt.u32.totalorder %s1581_s15, %s2511_s6 }
  0x5e   : > { %p1584_p1 = pnand %p1582_p0, %p2025_p11 }
  0x60   : > { %p1585_p2 = pneg %p1584_p1 }
  0x62   : > { %p1590_p5 = pnand %p1588_p3, %p1585_p2 }
  0x64   : > { %1593 = shalt.err (!%p1590_p5)
}
  0x65   : > { %s1594_s27 = scalar_lea.vmem %s310_s11, 256  ;;  %p1602_p8 = scmp.lt.s32.totalorder %s310_s11, %s310_s11 }
  0x66   : > { %p1595_p7 = scmp.ne.s32.totalorder %s310_s11, %s1594_s27  ;;  %p1603_p13 = scmp.lt.s32.totalorder %s1594_s27, %s1594_s27 }
  0x68   : > { %p1597_p10 = pnand %p1595_p7, %p2025_p11  ;;  %p1604_p4 = por %p1603_p13, %p1602_p8 }
  0x6a   : > { %p1598_p12 = pneg %p1597_p10 }
  0x6c   : > { %p1605_p6 = pnand %p1604_p4, %p1598_p12 }
  0x6e   : > { %1608 = shalt.err (!%p1605_p6)
}
  0x6f   : > { %1389 = dma.hbm_to_vmem [thread:$0]  (!%p2009_p9), %s2511_s6, 256, %s310_s11, [#allocation15], %s2493_s10, %s2493_s10, %s2495_s12  }
  0x70   : > { %s1889_s22 = smov [#allocation13]   ;;  %s1890_s14 = smov [#allocation16]  }
  0x71   : > { %s296_s13 = sshll.u32 %s1889_s22, 4  ;;  %s323_s15 = sshll.u32 %s1890_s14, 4  ;;  %s297_s13 = int_to_ptr.vmem [resolvable:$true] %s296_s13  ;;  %s324_s15 = int_to_ptr.vmem [resolvable:$true] %s323_s15 }
  0x72   : > { %s2512_s5 = sld [smem:[#allocation32_spill]] }
  0x78   : > { %s1609_s26 = scalar_lea.hbm %s2512_s5, 256 }
  0x79   : > { %p1610_p4 = scmp.ne.s32.totalorder %s2512_s5, %s1609_s26  ;;  %p1616_p1 = scmp.lt.u32.totalorder %s1609_s26, %s2512_s5 }
  0x7b   : > { %p1612_p6 = pnand %p1610_p4, %p2025_p11 }
  0x7d   : > { %p1613_p0 = pneg %p1612_p6 }
  0x7f   : > { %p1618_p2 = pnand %p1616_p1, %p1613_p0 }
  0x81   : > { %1621 = shalt.err (!%p1618_p2)
}
  0x82   : > { %s1622_s11 = scalar_lea.vmem %s297_s13, 256  ;;  %p1630_p10 = scmp.lt.s32.totalorder %s297_s13, %s297_s13 }
  0x83   : > { %p1623_p3 = scmp.ne.s32.totalorder %s297_s13, %s1622_s11  ;;  %p1631_p12 = scmp.lt.s32.totalorder %s1622_s11, %s1622_s11 }
  0x85   : > { %p1625_p5 = pnand %p1623_p3, %p2025_p11  ;;  %p1632_p8 = por %p1631_p12, %p1630_p10 }
  0x87   : > { %p1626_p7 = pneg %p1625_p5 }
  0x89   : > { %p1633_p13 = pnand %p1632_p8, %p1626_p7 }
  0x8b   : > { %1636 = shalt.err (!%p1633_p13)
}
  0x8c   : > { %1386 = dma.hbm_to_vmem [thread:$0]  (!%p2009_p9), %s2512_s5, 256, %s297_s13, [#allocation12], %s2493_s10, %s2493_s10, %s2495_s12  }
  0x8d   : > { %s2513_s7 = sld [smem:[#allocation34_spill]] }
  0x93   : > { %s1637_s16 = scalar_lea.hbm %s2513_s7, 16 }
  0x94   : > { %p1638_p4 = scmp.ne.s32.totalorder %s2513_s7, %s1637_s16  ;;  %p1644_p1 = scmp.lt.u32.totalorder %s1637_s16, %s2513_s7 }
  0x96   : > { %p1640_p6 = pnand %p1638_p4, %p2025_p11 }
  0x98   : > { %p1641_p0 = pneg %p1640_p6 }
  0x9a   : > { %p1646_p2 = pnand %p1644_p1, %p1641_p0 }
  0x9c   : > { %1649 = shalt.err (!%p1646_p2)
}
  0x9d   : > { %s1650_s30 = scalar_lea.vmem %s324_s15, 16  ;;  %s1657_s13 = scalar_lea.vmem %s324_s15, 32 }
  0x9e   : > { %p1651_p3 = scmp.ne.s32.totalorder %s324_s15, %s1650_s30  ;;  %p1658_p10 = scmp.lt.s32.totalorder %s324_s15, %s324_s15 }
  0x9f   : > { %p1659_p12 = scmp.lt.s32.totalorder %s1657_s13, %s1650_s30 }
  0xa0   : > { %p1653_p5 = pnand %p1651_p3, %p2025_p11 }
  0xa1   : > { %p1660_p8 = por %p1659_p12, %p1658_p10 }
  0xa2   : > { %p1654_p7 = pneg %p1653_p5 }
  0xa4   : > { %p1661_p13 = pnand %p1660_p8, %p1654_p7 }
  0xa6   : > { %1664 = shalt.err (!%p1661_p13)
}
  0xa7   : > { %1392 = dma.hbm_to_vmem [thread:$0]  (!%p2009_p9), %s2513_s7, 16, %s324_s15, [#allocation15]  }
  0xa8   : > { %s1891_s9 = smov [#allocation17]   ;;  %s1665_s18 = scalar_lea.hbm %s2488_s8, 16 }
  0xa9   : > { %s334_s22 = sshll.u32 %s1891_s9, 4  ;;  %p1666_p4 = scmp.ne.s32.totalorder %s2488_s8, %s1665_s18  ;;  %s335_s22 = int_to_ptr.vmem [resolvable:$true] %s334_s22 }
  0xaa   : > { %p1672_p1 = scmp.lt.u32.totalorder %s1665_s18, %s2488_s8 }
  0xab   : > { %p1668_p6 = pnand %p1666_p4, %p2025_p11 }
  0xad   : > { %p1669_p0 = pneg %p1668_p6 }
  0xaf   : > { %p1674_p2 = pnand %p1672_p1, %p1669_p0 }
  0xb1   : > { %1677 = shalt.err (!%p1674_p2)
}
  0xb2   : > { %s1678_s15 = scalar_lea.vmem %s335_s22, 16  ;;  %s1685_s13 = scalar_lea.vmem %s335_s22, 32 }
  0xb3   : > { %p1679_p3 = scmp.ne.s32.totalorder %s335_s22, %s1678_s15  ;;  %p1686_p10 = scmp.lt.s32.totalorder %s335_s22, %s335_s22 }
  0xb4   : > { %p1687_p12 = scmp.lt.s32.totalorder %s1685_s13, %s1678_s15 }
  0xb5   : > { %p1681_p5 = pnand %p1679_p3, %p2025_p11 }
  0xb6   : > { %p1688_p8 = por %p1687_p12, %p1686_p10 }
  0xb7   : > { %p1682_p7 = pneg %p1681_p5 }
  0xb9   : > { %p1689_p13 = pnand %p1688_p8, %p1682_p7 }
  0xbb   : > { %1692 = shalt.err (!%p1689_p13)
}
  0xbc   : > { %1395 = dma.hbm_to_vmem [thread:$0]  (!%p2009_p9), %s2488_s8, 16, %s335_s22, [#allocation18]  }
  0xbd   : > { %s1151_s17 = sadd.s32 4294967294, %s1869_s23   ;;  %s47_s9 = sadd.s32 1, %s1865_s0 }
  0xbe   : > { %p49_p11 = scmp.ge.s32.totalorder %s47_s9, 2  ;;  %s54_s28 = sadd.s32 1, %s1857_s21 }
  0xbf   : > { %p61_p4 = scmp.ne.s32.totalorder %s1857_s21, %s1853_s20  ;;  %p62_p6 = scmp.eq.s32.totalorder %s1869_s23, 0 }
  0xc0   : > { %s2547_s9 = smov (%p49_p11, %s47_s9), 0  ;;  %p67_p1 = scmp.ne.s32.totalorder %s1853_s20, %s1849_s19 }
  0xc1   : > { %p2162_p0 = por %p62_p6, %p61_p4  ;;  %s51_s22 = ssub.s32 %s1865_s0, %s2547_s9 }
  0xc2   : > { %p245_p9 = scmp.eq.s32.totalorder %s1993_s24, 1  ;;  %p52_p2 = scmp.eq.s32.totalorder %s51_s22, 0 }
  0xc3   : > { %p2515_p3 = scmp.eq.s32.totalorder %s1993_s24, 0  ;;  %p251_p10 = scmp.eq.s32.totalorder %s1151_s17, 1 }
  0xc4   : > { %p2177_p7 = por %p245_p9, %p61_p4  ;;  %p1413_p8 = scmp.lt.s32.totalorder %s1869_s23, 2 }
  0xc5   : > { %p2173_p5 = por %p2515_p3, %p67_p1  ;;  %p2184_p12 = por %p251_p10, %p67_p1 }
  0xc6   : > { %s2517_s18 = scalar_select %p2177_p7, 1, 0 }
  0xc7   : > { %s2182_s26 = scalar_select %p52_p2, %s1857_s21, %s54_s28  }
  0xc8   : > { %s2518_s29 = scalar_select %p2184_p12, 1, 0 }
  0xc9   : > { %s2190_s27 = sand.u32 1, %s1857_s21   ;;  %s1208_s30 = sshll.u32 %s1865_s0, 8 }
  0xca   : > { %s1160_s15 = sshll.u32 %s2190_s27, 4  ;;  %s2519_s1 = sld [smem:[#allocation29_spill]] }
  0xcb   : > { %s349_s17 = scalar_lea.vmem [#allocation5], %s1160_s15  ;;  %p2201_p13 = pnand %p1413_p8, %p2162_p0 }
  0xcc   : > { %s356_s28 = sshll.u32 %s349_s17, 4  ;;  %s346_s12 = scalar_lea.sflag [#allocation6], %s2190_s27  ;;  %s2205_s28 = int_to_ptr.vmem [resolvable:$true] %s356_s28 }
  0xcd   : > { %p1695_p4 = pneg %p2201_p13 }
  0xd0   : > { %s2197_s3 = scalar_lea.hbm %s2519_s1, %s1208_s30  ;;  %s1698_s15 = scalar_lea.hbm %s2519_s1, 512 }
  0xd1   : > { %s1693_s13 = scalar_lea.hbm %s2197_s3, 256  ;;  %p1699_p0 = scmp.lt.u32.totalorder %s2197_s3, %s2519_s1 }
  0xd2   : > { %p1694_p11 = scmp.ne.s32.totalorder %s2197_s3, %s1693_s13  ;;  %p1700_p9 = scmp.lt.u32.totalorder %s1698_s15, %s1693_s13 }
  0xd3   : > { %p1702_p3 = scmp.lt.u32.totalorder %s1693_s13, %s2197_s3 }
  0xd4   : > { %p1696_p6 = pnand %p1695_p4, %p1694_p11  ;;  %p1701_p2 = por %p1700_p9, %p1699_p0 }
  0xd6   : > { %p1697_p1 = pneg %p1696_p6  ;;  %p1703_p10 = por %p1702_p3, %p1701_p2 }
  0xd8   : > { %p1704_p8 = pnand %p1703_p10, %p1697_p1 }
  0xda   : > { %1707 = shalt.err (!%p1704_p8)
}
  0xdb   : > { %s1708_s10 = scalar_lea.vmem %s2205_s28, 256  ;;  %s1892_s30 = smov [#allocation5]  }
  0xdc   : > { %p1709_p11 = scmp.ne.s32.totalorder %s2205_s28, %s1708_s10  ;;  %s1713_s14 = sshll.u32 %s1892_s30, 4  ;;  %s1714_s14 = int_to_ptr.vmem [resolvable:$false] %s1713_s14 }
  0xdd   : > { %s1715_s11 = scalar_lea.vmem %s1714_s14, 512  ;;  %p1716_p7 = scmp.lt.s32.totalorder %s2205_s28, %s1714_s14 }
  0xde   : > { %p1711_p6 = pnand %p1709_p11, %p1695_p4  ;;  %p1717_p0 = scmp.lt.s32.totalorder %s1715_s11, %s1708_s10 }
  0xe0   : > { %p1712_p12 = pneg %p1711_p6  ;;  %p1718_p9 = por %p1717_p0, %p1716_p7 }
  0xe2   : > { %p1719_p2 = pnand %p1718_p9, %p1712_p12 }
  0xe4   : > { %1722 = shalt.err (!%p1719_p2)
}
  0xe5   : > { %s2521_s13 = smov 8   ;;  %s2522_s15 = smov 128  }
  0xe6   : > { %1399 = dma.hbm_to_vmem [thread:$0]  (!%p2201_p13), %s2197_s3, 256, %s2205_s28, %s346_s12, %s2522_s15, %s2522_s15, %s2521_s13  }
  0xe7   : > { %s1163_s17 = sshll.u32 %s2190_s27, 7  ;;  %s1209_s30 = sshll.u32 %s1865_s0, 11 }
  0xe8   : > { %s2244_s11 = scalar_lea.hbm %s2482_s2, %s1209_s30  ;;  %s370_s1 = scalar_lea.vmem [#allocation8], %s1163_s17 }
  0xe9   : > { %s379_s4 = sshll.u32 %s370_s1, 4  ;;  %s2523_s5 = sand.u32 1, %s1869_s23   ;;  %s2246_s4 = int_to_ptr.vmem [resolvable:$true] %s379_s4 }
  0xea   : > { %s2250_s6 = scalar_lea.sflag [#allocation9], %s2523_s5  ;;  %s1723_s7 = scalar_lea.hbm %s2244_s11, 2048 }
  0xeb   : > { %p1724_p7 = scmp.ne.s32.totalorder %s2244_s11, %s1723_s7  ;;  %s1728_s3 = scalar_lea.hbm %s2482_s2, 4096 }
  0xec   : > { %p1729_p3 = scmp.lt.u32.totalorder %s2244_s11, %s2482_s2  ;;  %p1730_p10 = scmp.lt.u32.totalorder %s1728_s3, %s1723_s7 }
  0xed   : > { %p1726_p12 = pnand %p1724_p7, %p1695_p4  ;;  %p1732_p11 = scmp.lt.u32.totalorder %s1723_s7, %s2244_s11 }
  0xee   : > { %p1731_p8 = por %p1730_p10, %p1729_p3 }
  0xef   : > { %p1727_p1 = pneg %p1726_p12 }
  0xf0   : > { %p1733_p6 = por %p1732_p11, %p1731_p8 }
  0xf2   : > { %p1734_p0 = pnand %p1733_p6, %p1727_p1 }
  0xf4   : > { %1737 = shalt.err (!%p1734_p0)
}
  0xf5   : > { %s1738_s1 = scalar_lea.vmem %s2246_s4, 2048  ;;  %s1893_s5 = smov [#allocation8]  }
  0xf6   : > { %p1739_p9 = scmp.ne.s32.totalorder %s2246_s4, %s1738_s1  ;;  %s1743_s17 = sshll.u32 %s1893_s5, 4  ;;  %s1744_s17 = int_to_ptr.vmem [resolvable:$false] %s1743_s17 }
  0xf7   : > { %s1745_s10 = scalar_lea.vmem %s1744_s17, 4096  ;;  %p1746_p12 = scmp.lt.s32.totalorder %s2246_s4, %s1744_s17 }
  0xf8   : > { %p1741_p2 = pnand %p1739_p9, %p1695_p4  ;;  %p1747_p3 = scmp.lt.s32.totalorder %s1745_s10, %s1738_s1 }
  0xfa   : > { %p1742_p7 = pneg %p1741_p2  ;;  %p1748_p10 = por %p1747_p3, %p1746_p12 }
  0xfc   : > { %p1749_p8 = pnand %p1748_p10, %p1742_p7 }
  0xfe   : > { %1752 = shalt.err (!%p1749_p8)
}
  0xff   : > { %1402 = dma.hbm_to_vmem [thread:$0]  (!%p2201_p13), %s2244_s11, 2048, %s2246_s4, %s2250_s6, %s2522_s15, %s2522_s15, %s2521_s13  }
 0x100   : > { %p2524_p4 = scmp.ne.s32.totalorder %s2506_s25, 0 }
 0x101   : > { %s2282_s7 = sand.u32 (!%p2524_p4), 1, %s1853_s20  }
 0x102   : > { %391 = sbr.rel (%p2524_p4) target bundleno = 1122 (0x462), region = 52  ;;  %s1167_s14 = sshll.u32 (!%p2524_p4), %s2282_s7, 4 }
 0x103   : > { %s394_s12 = scalar_lea.sflag (!%p2524_p4), [#allocation6], %s2282_s7  ;;  %s2288_s22 = scalar_lea.vmem (!%p2524_p4), [#allocation5], %s1167_s14 }
 0x109   : > { %1820 = dma.done.wait (%p2173_p5), %s394_s12, 256  }
 0x10a   : > { %1822 = vsyncadd (%p2173_p5), %s394_s12, 4294967040  ;;  %s402_s4 = sand.u32 1, %s1993_s24   ;;  %s1168_s6 = sshll.u32 %s2282_s7, 7 }
 0x10b   : > { %s403_s25 = scalar_lea.sflag [#allocation9], %s402_s4  ;;  %s2296_s13 = scalar_lea.vmem [#allocation8], %s1168_s6 }
 0x10c   : > { %1824 = dma.done.wait (%p2173_p5), %s403_s25, 2048  }
 0x10d   : > { %1826 = vsyncadd (%p2173_p5), %s403_s25, 4294965248  ;;  %p2525_p13 = scmp.eq.s32.totalorder %s1993_s24, 0 }
 0x10f   : > { %1828 = dma.done.wait (%p2525_p13), [#allocation9], 512   ;;  %p2526_p1 = pmov %p2525_p13 }
 0x111   : > { %1830 = vsyncadd (%p2526_p1), [#allocation9], 4294966784  ;;  %p2527_p11 = pmov %p2526_p1 }
 0x112   : > { %p2528_p6 = pmov %p2526_p1 }
 0x113   : > { %1832 = dma.done.wait (%p2527_p11), [#allocation12], 768  }
 0x114   : > { %1834 = vsyncadd (%p2528_p6), [#allocation12], 4294966528  ;;  %p2529_p0 = pmov %p2526_p1 }
 0x116   : > { %1836 = dma.done.wait (%p2529_p0), [#allocation15], 272   ;;  %p2530_p9 = pmov %p2529_p0 }
 0x117   : > { %p2531_p5 = pmov %p2529_p0 }
 0x118   : > { %1838 = vsyncadd (%p2530_p9), [#allocation15], 4294967024 }
 0x119   : > { %1840 = dma.done.wait (%p2531_p5), [#allocation18], 16   ;;  %p2532_p2 = pmov %p2529_p0 }
 0x11a   : > { %s2533_s16 = sld [smem:[#allocation28_spill]]  ;;  %v1894_v0 = vmov 0   ;;  %vm522_vm0 = vcmask 261120   ;;  %v478_v2 = vld [vmem:[%s2296_s13] sm:$0xff]  ;;  %v479_v3 = vld [vmem:[%s2296_s13 + $0x8] sm:$0xff]  ;;  %v480_v4 = vld [vmem:[%s2296_s13 + $0x10] sm:$0xff] }
 0x11b   : > { %1842 = vsyncadd (%p2532_p2), [#allocation18], 4294967280  ;;  %1508 = vset.pattern.permute.xlu1 %v1894_v0  ;;  %1507 = vset.pattern.permute.xlu0 %v1894_v0  ;;  %v1291_v5 = vpack.c.bf16 %v479_v3, %v478_v2  ;;  %v481_v6 = vld [vmem:[%s2296_s13 + $0x18] sm:$0xff]  ;;  %v494_v8 = vld [vmem:[#allocation10] sm:$0xff]  ;;  %vm473_vm2 = vcmask 130048   ;;  %v1895_v39 = vmov 0.0  }
 0x11c   : > { %vm2323_vm1 = vmpackc.low %vm522_vm0, %vm522_vm0  ;;  %v1297_v7 = vpack.c.bf16 %v481_v6, %v480_v4  ;;  %v482_v9 = vld [vmem:[%s2296_s13 + $0x20] sm:$0xff]  ;;  %v483_v10 = vld [vmem:[%s2296_s13 + $0x28] sm:$0xff]  ;;  %1271 = vmatprep.mubr.msk.f32.mxu0 %vm522_vm0, %v494_v8  ;;  %474 = vst.msk [vmem:[#allocation2] sm:$0xff] %vm473_vm2, %v1895_v39  ;;  %s2401_s11 = scalar_lea.vmem [#allocation19], %s1167_s14  ;;  %s2403_s27 = smov 0  }
 0x11d   : > { %1293 = vmatprep.subr.msk.bf16.mxu0 %vm2323_vm1, %v1291_v5  ;;  %v668_v11 = vld [vmem:[#allocation13] sm:$0xff]  ;;  %v669_v13 = vld [vmem:[#allocation13 + $0x8] sm:$0xff]  ;;  %v1303_v14 = vpack.c.bf16 %v483_v10, %v482_v9  ;;  %v683_v16 = vld [vmem:[#allocation14 + $0x8] sm:$0xff]  ;;  %475 = vst.msk [vmem:[#allocation2 + $0x8] sm:$0xff] %vm473_vm2, %v1895_v39 }
 0x11e   : > { %1296 = vmatpush3.bf16.xpose.msk.msra.mxu0 %vm2323_vm1, %v1291_v5  ;;  %672 = vperm.xlu1 %1508, %v668_v11   ;;  %v498_v12 = vld [vmem:[#allocation11] sm:$0xff]  ;;  %v499_v15 = vld [vmem:[#allocation11 + $0x8] sm:$0xff]  ;;  %v682_v17 = vld [vmem:[#allocation14] sm:$0xff] }
 0x11f   : > { %1299 = vmatprep.subr.msk.bf16.mxu0 %vm2323_vm1, %v1297_v7  ;;  %504 = vperm.xlu0 %1507, %v498_v12   ;;  %v484_v18 = vld [vmem:[%s2296_s13 + $0x30] sm:$0xff]  ;;  %v485_v19 = vld [vmem:[%s2296_s13 + $0x38] sm:$0xff]  ;;  %v486_v23 = vld [vmem:[%s2296_s13 + $0x40] sm:$0xff] }
 0x120   : > { %s2319_s15 = sld [smem:[#allocation4 + %s2533_s16]]  ;;  %v501_v20 = vld [vmem:[#allocation11 + $0x18] sm:$0xff]  ;;  %v1309_v21 = vpack.c.bf16 %v485_v19, %v484_v18  ;;  %v500_v22 = vld [vmem:[#allocation11 + $0x10] sm:$0xff]  ;;  %v487_v24 = vld [vmem:[%s2296_s13 + $0x48] sm:$0xff] }
 0x121   : > { %v1315_v25 = vpack.c.bf16 %v487_v24, %v486_v23  ;;  %v488_v26 = vld [vmem:[%s2296_s13 + $0x50] sm:$0xff]  ;;  %v489_v27 = vld [vmem:[%s2296_s13 + $0x58] sm:$0xff]  ;;  %v490_v29 = vld [vmem:[%s2296_s13 + $0x60] sm:$0xff] }
 0x122   : > { %677 = vperm.xlu1 %1508, %v669_v13   ;;  %v1321_v28 = vpack.c.bf16 %v489_v27, %v488_v26  ;;  %v491_v30 = vld [vmem:[%s2296_s13 + $0x68] sm:$0xff]  ;;  %v492_v32 = vld [vmem:[%s2296_s13 + $0x70] sm:$0xff]  ;;  %v493_v33 = vld [vmem:[%s2296_s13 + $0x78] sm:$0xff]  ;;  %v1871_v26 = vmov 1065353216   ;;  %v1875_v27 = vmov 0  }
 0x123   : > { %509 = vperm.xlu0 %1507, %v499_v15   ;;  %v1327_v31 = vpack.c.bf16 %v491_v30, %v490_v29  ;;  %v1333_v34 = vpack.c.bf16 %v493_v33, %v492_v32  ;;  %v495_v35 = vld [vmem:[#allocation10 + $0x8] sm:$0xff]  ;;  %v496_v36 = vld [vmem:[#allocation10 + $0x10] sm:$0xff]  ;;  %v497_v37 = vld [vmem:[#allocation10 + $0x18] sm:$0xff] }
 0x124   : > { %v2381_v38 = vld [vmem:[%s2288_s22] sm:$0xff]  ;;  %v2392_v63 = vld [vmem:[%s2288_s22 + $0x8] sm:$0xff] }
 0x125   : > { %1281 = vmatprep.mubr.msk.f32.mxu1 %vm473_vm2, %v2381_v38 }
 0x126   : > { %s811_s24 = scvt.s32.f32 %s2319_s15  ;;  %1302 = vmatpush3.bf16.xpose.msk.msra.mxu0 %vm2323_vm1, %v1297_v7  ;;  %691 = vperm.xlu1 %1508, %v683_v16  }
 0x127   : > { %1305 = vmatprep.subr.msk.bf16.mxu0 %vm2323_vm1, %v1303_v14  ;;  %686 = vperm.xlu0 %1507, %v682_v17  }
 0x12a   : > { %519 = vperm.xlu1 %1508, %v501_v20  }
 0x12b   : > { %514 = vperm.xlu0 %1507, %v500_v22   ;;  %v801_v22 = vlaneseq }
 0x12d   : > { %v802_v23 = vand.u32 127, %v801_v22 }
 0x12e   : > { %1308 = vmatpush3.bf16.xpose.msk.msra.mxu0 %vm2323_vm1, %v1303_v14 }
 0x12f   : > { %1311 = vmatprep.subr.msk.bf16.mxu0 %vm2323_vm1, %v1309_v21  ;;  %vm806_vm3 = vcmp.lt.s32.totalorder %v802_v23, 8 }
 0x136   : > { %1314 = vmatpush3.bf16.xpose.msk.msra.mxu0 %vm2323_vm1, %v1309_v21 }
 0x137   : > { %1317 = vmatprep.subr.msk.bf16.mxu0 %vm2323_vm1, %v1315_v25 }
 0x13e   : > { %1320 = vmatpush3.bf16.xpose.msk.msra.mxu0 %vm2323_vm1, %v1315_v25 }
 0x13f   : > { %1323 = vmatprep.subr.msk.bf16.mxu0 %vm2323_vm1, %v1321_v28 }
 0x146   : > { %1326 = vmatpush3.bf16.xpose.msk.msra.mxu0 %vm2323_vm1, %v1321_v28 }
 0x147   : > { %1329 = vmatprep.subr.msk.bf16.mxu0 %vm2323_vm1, %v1327_v31 }
 0x14e   : > { %1332 = vmatpush3.bf16.xpose.msk.msra.mxu0 %vm2323_vm1, %v1327_v31 }
 0x14f   : > { %1335 = vmatprep.subr.msk.bf16.mxu0 %vm2323_vm1, %v1333_v34 }
 0x156   : > { %1338 = vmatpush3.bf16.xpose.msk.msra.mxu0 %vm2323_vm1, %v1333_v34 }
 0x15d   : > { %1272 = vmatmul.mubr.msk.f32.vlgmr.msra.gmra.mrb[0].mxu0 %vm522_vm0, %v495_v35 }
 0x15e   : > { %1274 = vmatprep.mubr.msk.f32.mxu0 %vm522_vm0, %v496_v36 }
 0x161   : > { %1275 = vmatmul.mubr.msk.f32.gmra.mrb[2].mxu0 %vm522_vm0, %v497_v37 }
 0x19d   : > { %v673_v40 = vpop.permute.xlu1 %672 }
 0x19e   : > { %v505_v41 = vpop.permute.xlu0 %504 }
 0x1a1   : > { %v678_v42 = vpop.permute.xlu1 %677 }
 0x1a2   : > { %v510_v43 = vpop.permute.xlu0 %509 }
 0x1a5   : > { %v692_v44 = vpop.permute.xlu1 %691 }
 0x1a6   : > { %v687_v45 = vpop.permute.xlu0 %686 }
 0x1a9   : > { %v520_v51 = vpop.permute.xlu1 %519 }
 0x1aa   : > { %v515_v54 = vpop.permute.xlu0 %514 }
 0x230   : > { %v1273_v46 = vpop.f32.mrb[0].mxu0 }
 0x231   : > { %v655_v47 = vadd.f32 %v1273_v46, %v510_v43  ;;  %v649_v48 = vpop.f32.mrb[1].mxu0 }
 0x232   : > { %v650_v49 = vadd.f32 %v649_v48, %v505_v41 }
 0x233   : > { %v681_v50 = vmul.f32 %v678_v42, %v655_v47 }
 0x234   : > { %v680_v52 = vmul.f32 %v673_v40, %v650_v49  ;;  %v1276_v53 = vpop.f32.mrb[2].mxu0 }
 0x235   : > { %v2387_v55 = vadd.f32 %v1276_v53, %v520_v51  ;;  %v659_v56 = vpop.f32.mrb[3].mxu0  ;;  %v695_v57 = vadd.f32 %v692_v44, %v681_v50 }
 0x236   : > { %v2389_v58 = vadd.f32 %v659_v56, %v515_v54  ;;  %v694_v59 = vadd.f32 %v687_v45, %v680_v52 }
 0x237   : > { %v697_v60 = vmax.f32 %v695_v57, 0.0 }
 0x238   : > { %v696_v61 = vmax.f32 %v694_v59, 0.0 }
 0x23a   : > { %v1339_v62 = vpack.c.bf16 %v697_v60, %v696_v61 }
 0x23c   : > { %1340 = vmatprep.subr.bf16.mxu1 %v1339_v62 }
 0x23d   : > { %1342 = vmatpush3.bf16.msra.mxu1 %v1339_v62 }
 0x240   : > { %1282 = vmatmul.mubr.msk.f32.vlgmr.msra.gmra.mrb[0].mxu1 %vm473_vm2, %v2392_v63 }
 0x313   : > { %v1283_v0 = vpop.f32.mrb[0].mxu1 }
 0x314   : > { %v771_v1 = vpop.f32.mrb[1].mxu1 }
 0x315   : > { %v780_v2 = vmax.f32 %v771_v1, %v1283_v0 }
 0x317   : > { %v781_v3 = vrot.slane %v780_v2, 4 }
 0x319   : > { %v782_v4 = vmax.f32 %v780_v2, %v781_v3 }
 0x31b   : > { %v783_v5 = vrot.slane %v782_v4, 2 }
 0x31d   : > { %v784_v6 = vmax.f32 %v782_v4, %v783_v5 }
 0x31f   : > { %v785_v7 = vrot.slane %v784_v6, 1 }
 0x321   : > { %v786_v8 = vmax.f32 %v784_v6, %v785_v7 }
 0x323   : > { %v787_v9 = vsub.f32 %v771_v1, %v786_v8  ;;  %v788_v10 = vsub.f32 %v1283_v0, %v786_v8 }
 0x325   : > { %v789_v11 = vmul.f32 1.442695, %v787_v9  ;;  %v791_v12 = vmul.f32 1.442695, %v788_v10 }
 0x327   : > { %1509 = vpow2.f32 %v789_v11 }
 0x328   : > { %1511 = vpow2.f32 %v791_v12 }
 0x331   : > { %v1510_v13 = vpop.eup %1509 }
 0x332   : > { %v2396_v14 = vpop.eup %1511 }
 0x333   : > { %v793_v15 = vadd.f32 %v2396_v14, %v1510_v13 }
 0x335   : > { %v794_v16 = vrot.slane %v793_v15, 4 }
 0x337   : > { %v795_v17 = vadd.f32 %v794_v16, %v793_v15 }
 0x339   : > { %v796_v18 = vrot.slane %v795_v17, 2 }
 0x33b   : > { %v797_v19 = vadd.f32 %v796_v18, %v795_v17 }
 0x33d   : > { %v798_v20 = vrot.slane %v797_v19, 1 }
 0x33f   : > { %v799_v21 = vadd.f32 %v798_v20, %v797_v19 }
 0x341   : > { %1513 = vrcp.f32 %v799_v21 }
 0x34b   : > { %v1514_v24 = vpop.eup %1513 }
 0x34c   : > { %v807_v25 = vsel %vm806_vm3, %v1514_v24, 0.0 }
 0x34d LB: >> { %v820_v28 = vadd.s32 %v1873_v26, %v1877_v27  ;;  %v1896_v31 = vmov 0.0   ;;  %v834_v41 = vstv %s811_s24  ;;  %s817_s27 = sadd.s32 1, %s1881_s27   ;;  %s1881_s27 = sphi %s2403_s27, %s817_s27   ;;  %v1877_v27 = vphi %v1875_v27, %v1876_v27   ;;  %v1873_v26 = vphi %v1871_v26, %v838_v26  }
 0x34e   : >> { %p814_p7 = scmp.ge.s32.totalorder %s817_s27, 30  }
 0x34f   : >> { %v821_v29 = vadd.s32 1, %v820_v28  ;;  %v849_v45 = vmul.f32 (%p814_p7), %v807_v25, %v2389_v58  ;;  %v850_v46 = vmul.f32 (%p814_p7), %v807_v25, %v2387_v55  ;;  %p841_p12 = scmp.gt.s32.totalorder (%p814_p7), %s2319_s15, 0  ;;  %v852_v49 = vld [vmem:[#allocation2 + $0x8] sm:$0xff] (%p814_p7)  ;;  %s2536_s28 = sld [smem:[#allocation28_spill]] (%p814_p7)  ;;  %v851_v50 = vld [vmem:[#allocation2] sm:$0xff] (%p814_p7) }
 0x350   : > { %v1201_v55 = vld [vmem:[#allocation16] ss:$0 sm:$0xff] (%p814_p7)  ;;  %v1202_v57 = vld [vmem:[#allocation17] ss:$0 sm:$0xff] (%p814_p7)  ;;  %s975_s1 = sshll.u32 (%p814_p7), %s2401_s11, 4  ;;  %s2537_s10 = sld [smem:[#allocation35_spill]] (%p814_p7)  ;;  %s2426_s1 = int_to_ptr.vmem [resolvable:$true] %s975_s1 }
 0x351   : >> { %v822_v30 = vshra.s32 %v821_v29, 1  ;;  %v1343_v47 = vpack.c.bf16 (%p814_p7), %v850_v46, %v849_v45  ;;  %s962_s12 = scalar_lea.sflag (%p814_p7), [#allocation7], %s2282_s7  ;;  %s1753_s22 = scalar_lea.vmem (%p814_p7), %s2426_s1, 256 }
 0x352   : > { %p1754_p3 = scmp.ne.s32.totalorder (%p814_p7), %s2426_s1, %s1753_s22  ;;  %p2538_p10 = scmp.ne.s32.totalorder (%p814_p7), %s2517_s18, 0 }
 0x353   : >> { %vm823_vm4 = vcmp.ge.s32.totalorder %v1510_v13, %v822_v30  ;;  %vm824_vm5 = vcmp.ge.s32.totalorder %v2396_v14, %v822_v30  ;;  %v1198_v42 = vadd.s32 4294967295, %v822_v30  ;;  %1344 = vmatprep.subr.bf16.mxu1 (%p814_p7), %v1343_v47  ;;  %s1897_s4 = smov (%p814_p7), [#allocation19]  }
 0x354   : >> { %v825_v32 = vsel %vm823_vm4, 1.0, %v1896_v31  ;;  %v826_v33 = vsel %vm824_vm5, 1.0, %v1896_v31  ;;  %1346 = vmatpush3.bf16.xpose.msra.mxu1 (%p814_p7), %v1343_v47  ;;  %p1755_p8 = pnand (%p814_p7), %p1754_p3, %p2538_p10  ;;  %s1757_s6 = sshll.u32 (%p814_p7), %s1897_s4, 4  ;;  %s1758_s6 = int_to_ptr.vmem [resolvable:$false] %s1757_s6 }
 0x355   : >> { %v827_v34 = vadd.f32 %v826_v33, %v825_v32  ;;  %s1210_s30 = sshll.u32 (%p814_p7), %s2536_s28, 8  ;;  %s1759_s25 = scalar_lea.vmem (%p814_p7), %s1758_s6, 512 }
 0x356   : > { %s2424_s14 = scalar_lea.hbm (%p814_p7), %s2537_s10, %s1210_s30  ;;  %p1756_p4 = pneg (%p814_p7), %p1755_p8 }
 0x357   : >> { %v828_v35 = vrot.slane %v827_v34, 4  ;;  %p1760_p13 = scmp.lt.s32.totalorder (%p814_p7), %s2426_s1, %s1758_s6  ;;  %p1761_p1 = scmp.lt.s32.totalorder (%p814_p7), %s1759_s25, %s1753_s22 }
 0x359   : >> { %v829_v36 = vadd.f32 %v828_v35, %v827_v34  ;;  %p1762_p11 = por (%p814_p7), %p1761_p1, %p1760_p13 }
 0x35b   : >> { %v830_v37 = vrot.slane %v829_v36, 2  ;;  %p1763_p6 = pnand (%p814_p7), %p1762_p11, %p1756_p4 }
 0x35d   : >> { %v831_v39 = vadd.f32 %v830_v37, %v829_v36 }
 0x35f   : >> { %v832_v40 = vrot.slane %v831_v39, 1  ;;  %816 = sbr.rel (!%p814_p7) target bundleno = 845 (0x34d), region = 149 }
 0x361   : >> { %v833_v43 = vadd.f32 %v832_v40, %v831_v39 }
 0x363   : >> { %vm835_vm6 = vcmp.ge.f32.partialorder %v833_v43, %v834_v41 }
 0x364   : >> { %v836_v44 = vsel %vm835_vm6, %v822_v30, %v1877_v27   ;;  %v838_v26 = vsel %vm835_vm6, %v1873_v26, %v1198_v42  }
 0x365   : >> { %v1876_v27 = vmov %v836_v44   ;;  %vm839_vm7 = vcmp.ge.s32.totalorder (%p814_p7), %v1510_v13, %v836_v44  ;;  %vm840_vm10 = vcmp.ge.s32.totalorder (%p814_p7), %v2396_v14, %v836_v44 }
 0x366   : > { %s842_s3 = scalar_select %p841_p12, 1, 0 }
 0x368   : > { %v843_v48 = vstv %s842_s3 }
 0x369   : > { %vm844_vm8 = vcmp.eq.s32.totalorder %v843_v48, 1 }
 0x36a   : > { %vm845_vm9 = vmand %vm839_vm7, %vm844_vm8 }
 0x36b   : > { %1288 = vmatprep.mubr.msk.f32.mxu1 %vm845_vm9, %v1510_v13  ;;  %vm846_vm11 = vmand %vm840_vm10, %vm844_vm8 }
 0x36c   : > { %1289 = vmatmul.mubr.msk.f32.vlgmr.msra.gmra.mrb[2].mxu1 %vm846_vm11, %v2396_v14 }
 0x43f   : > { %v1290_v51 = vpop.f32.mrb[2].mxu1 }
 0x440   : > { %v929_v52 = vadd.f32 %v1290_v51, %v852_v49  ;;  %v919_v53 = vpop.f32.mrb[3].mxu1 }
 0x441   : > { %v928_v54 = vadd.f32 %v919_v53, %v851_v50 }
 0x442   : > { %931 = vst.msk [vmem:[#allocation2 + $0x8] sm:$0xff] %vm473_vm2, %v929_v52 }
 0x443   : > { %930 = vst.msk [vmem:[#allocation2] sm:$0xff] %vm473_vm2, %v928_v54 }
 0x449   : > { %v936_v56 = vld [vmem:[#allocation2 + $0x8] sm:$0xff] }
 0x44a   : > { %v935_v58 = vld [vmem:[#allocation2] sm:$0xff]  ;;  %v945_v59 = vmul.f32 %v1201_v55, %v936_v56 }
 0x44b   : > { %v944_v60 = vmul.f32 %v1201_v55, %v935_v58 }
 0x44c   : > { %v954_v61 = vadd.f32 %v1202_v57, %v945_v59 }
 0x44d   : > { %v953_v62 = vadd.f32 %v1202_v57, %v944_v60 }
 0x44e   : > { %v956_v0 = vmax.f32 %v954_v61, 0.0 }
 0x44f   : > { %v955_v1 = vmax.f32 %v953_v62, 0.0 }
 0x450   : > { %v958_v2 = vadd.f32 %v956_v0, %v2392_v63 }
 0x451   : > { %v957_v3 = vadd.f32 %v955_v1, %v2381_v38 }
 0x452   : > { %960 = vst.msk [vmem:[%s2401_s11 + $0x8] sm:$0xff] %vm473_vm2, %v958_v2 }
 0x453   : > { %959 = vst.msk [vmem:[%s2401_s11] sm:$0xff] %vm473_vm2, %v957_v3 }
 0x454   : > { %1766 = shalt.err (!%p1763_p6)
}
 0x455   : > { %s1767_s13 = scalar_lea.hbm %s2424_s14, 256  ;;  %s1771_s24 = scalar_lea.hbm %s2537_s10, 512 }
 0x456   : > { %p1768_p0 = scmp.ne.s32.totalorder %s2424_s14, %s1767_s13  ;;  %p1772_p2 = scmp.lt.u32.totalorder %s2424_s14, %s2537_s10 }
 0x457   : > { %p1773_p7 = scmp.lt.u32.totalorder %s1771_s24, %s1767_s13  ;;  %p1775_p3 = scmp.lt.u32.totalorder %s1767_s13, %s2424_s14 }
 0x458   : > { %p1769_p9 = pnand %p1768_p0, %p2538_p10 }
 0x459   : > { %p1774_p12 = por %p1773_p7, %p1772_p2 }
 0x45a   : > { %p1770_p5 = pneg %p1769_p9 }
 0x45b   : > { %p1776_p8 = por %p1775_p3, %p1774_p12 }
 0x45d   : > { %p1777_p4 = pnand %p1776_p8, %p1770_p5 }
 0x45f   : > { %1780 = shalt.err (!%p1777_p4)
}
 0x460   : > { %s1898_s3 = smov 128   ;;  %s1899_s28 = smov 8  }
 0x461   : > { %1375 = dma.vmem_to_hbm [thread:$0]  (%p2538_p10), %s2426_s1, 256, %s2424_s14, %s962_s12, %s1898_s3, %s1898_s3, %s1899_s28  }
 0x462 PF: > { %s990_s30 = sand.u32 1, %s1849_s19   ;;  %p2539_p13 = scmp.ne.s32.totalorder %s2518_s29, 0 }
 0x463   : > { %p2540_p1 = scmp.ge.s32.totalorder %s1869_s23, 2  ;;  %s991_s5 = scalar_lea.sflag [#allocation7], %s990_s30 }
 0x465   : > { %p1404_p11 = pnand %p2540_p1, %p2539_p13 }
 0x467   : > { %1844 = dma.done.wait (!%p1404_p11), %s991_s5, 256  }
 0x468   : > { %1846 = vsyncadd (!%p1404_p11), %s991_s5, 4294967040  ;;  %s35_s23 = sadd.s32 1, %s1869_s23   ;;  %s2541_s19 = smov %s1853_s20 }
 0x469   : > { %p32_p6 = scmp.ge.s32.totalorder %s35_s23, 4   ;;  %s2542_s20 = smov %s1857_s21 }
 0x46a   : > { %s2543_s21 = smov %s2182_s26  ;;  %s2544_s22 = smov %s1865_s0 }
 0x46b   : > { %s2545_s0 = smov %s2547_s9  ;;  %34 = sbr.rel (!%p32_p6) target bundleno = 25 (0x19), region = 160 }
 0x472   :  { %996 = vsyncpa [#allocation6], 1 }
 0x473   :  { %998 = vsyncpa [#allocation6 + $0x1], 1 }
 0x474   :  { %999 = vsyncpa [#allocation9], 1 }
 0x475   :  { %1001 = vsyncpa [#allocation9 + $0x1], 1 }
 0x476   :  { %1002 = vsyncpa [#allocation12], 1 }
 0x477   :  { %1003 = vsyncpa [#allocation15], 1 }
 0x478   :  { %1004 = vsyncpa [#allocation18], 1 }
 0x479   :  { %1005 = vsyncpa [#allocation7], 1 }
 0x47a   :  { %1007 = vsyncpa [#allocation7 + $0x1], 1 }

</bundles_post_ra>
